<compile_context>
chip_gen: v7x
topology: tpu7x:2x2x1
jax: 0.10.0
libtpu: 0.0.40
codegen_flags: <defaults>
</compile_context>

<pallas_src>
import functools

import jax
import jax.numpy as jnp
from jax import lax
from jax.experimental import pallas as pl
from jax.experimental.pallas import tpu as pltpu


def _round_up(x, m):
    return ((x + m - 1) // m) * m


def _pixel_merge_kernel(x_ref, w_ref, g_ref, b_ref, o_ref, *, eps, inv_d):
    # x_ref: (1, TS, K)   w_ref: (D, K)   g_ref/b_ref: (D, 1)   o_ref: (1, D, TS)
    x = x_ref[0]                                                   # (TS, K)
    # 1x1 conv (no bias) == channel matmul on the MXU, f32 accumulation.
    # Contract K with K -> (D, TS): channel-major result, stored straight to NCHW.
    y = lax.dot_general(w_ref[...], x, (((1,), (1,)), ((), ())),
                        preferred_element_type=jnp.float32)        # (D, TS)
    # Two-pass LayerNorm over the channel dim (axis 0), independently per spatial column.
    mean = jnp.sum(y, axis=0, keepdims=True) * inv_d               # (1, TS)
    yc = y - mean
    var = jnp.sum(yc * yc, axis=0, keepdims=True) * inv_d          # (1, TS)
    r = lax.rsqrt(var + eps)
    # affine + ReLU
    o_ref[0] = jnp.maximum(yc * r * g_ref[...] + b_ref[...], 0.0).astype(o_ref.dtype)


def _vmem_budget():
    """(block budget, vmem limit) derived from the chip's physical VMEM."""
    try:
        vmem_cap = int(pltpu.get_tpu_info().vmem_capacity_bytes)
    except Exception:
        vmem_cap = 64 << 20                    # conservative (v7x-sized) fallback
    if vmem_cap >= (128 << 20):                # v5e / v6e: 128 MiB VMEM
        return 24 << 20, 96 << 20
    return 14 << 20, 48 << 20                  # v7x: 64 MiB VMEM


def _choose_spatial_tile(S, B, K, D, block_budget):
    """Largest spatial tile whose DMA blocks + f32 intermediates fit the budget."""
    kp = _round_up(K, 128)
    dp = _round_up(D, 8)
    # Per spatial position: x block (2 bufs, K lanes) + out block (2 bufs, D sublanes)
    # + ~4 f32 (D, TS)-shaped in-kernel intermediates (y, centered y, products).
    per_ts = 4 * (2 * kp + 2 * dp + 4 * dp)
    # Grid-invariant operands (weight, gamma, beta) are double-buffered by default.
    fixed = 4 * (2 * dp * kp + 4 * dp * 128)
    ts = max(1, (block_budget - fixed) // per_ts)
    ts = min(ts, S, 32768)
    if ts < S:
        # Output block is (1, D, TS): its lane dim TS must be a multiple of 128
        # (lane-dense stores + BlockSpec legality) unless it is the full extent S.
        ts = (ts // 128) * 128
        if ts == 0:
            ts = S                              # tiny S: full-extent block is always legal
    if B == 1 and ts == S and S >= 256:
        # Keep at least 2 grid steps so both v7x TensorCores get work.
        ts = _round_up(pl.cdiv(S, 2), 128)
    return ts


def pixel_merging(x, conv_weight, ln_gamma, ln_beta, *, eps=1e-5):
    """x: (B, C, H, W) f32.  conv_weight: (out_dim, 4C, 1, 1).  Returns (B, out_dim, H//2, W//2)."""
    B, C, H, W = x.shape
    D = conv_weight.shape[0]
    H2, W2 = H // 2, W // 2
    S = H2 * W2
    K = 4 * C

    # 2x2 pixel unshuffle flattened to (B, S, K) with column order (dh, dw, c); one fused
    # XLA copy pass over x.
    # TODO(synk): fuse this unshuffle into the kernel's input DMA (needs a verified
    # in-kernel minor-dim (lane) deinterleave, or allow_input_fusion of the producer
    # transpose); until verified on all targets it stays a single wrapper-side pass.
    x_flat = (
        x.reshape(B, C, H2, 2, W2, 2)
        .transpose(0, 2, 4, 3, 5, 1)            # (B, H2, W2, dh, dw, C)
        .reshape(B, S, K)
    )
    # torch.cat([x0,x1,x2,x3]) orders quadrants q = dh + 2*dw; our columns use
    # q' = 2*dh + dw, so permute the weight's (tiny) quadrant axis with [0, 2, 1, 3].
    w_dk = (conv_weight.reshape(D, 4, C)[:, jnp.array([0, 2, 1, 3]), :]
            .reshape(D, K).astype(jnp.float32))                    # (D, K)
    g = ln_gamma.reshape(D, 1).astype(jnp.float32)
    b = ln_beta.reshape(D, 1).astype(jnp.float32)

    block_budget, vmem_limit = _vmem_budget()
    TS = _choose_spatial_tile(S, B, K, D, block_budget)
    grid = (B, pl.cdiv(S, TS))

    out = pl.pallas_call(
        functools.partial(_pixel_merge_kernel, eps=eps, inv_d=1.0 / D),
        out_shape=jax.ShapeDtypeStruct((B, D, S), x.dtype),
        grid_spec=pltpu.PrefetchScalarGridSpec(
            num_scalar_prefetch=0,
            grid=grid,
            in_specs=[
                pl.BlockSpec((1, TS, K), lambda bi, si: (bi, si, 0)),
                # Grid-invariant operands (never re-DMA'd; kept whole in VMEM).
                pl.BlockSpec((D, K), lambda bi, si: (0, 0)),
                pl.BlockSpec((D, 1), lambda bi, si: (0, 0)),
                pl.BlockSpec((D, 1), lambda bi, si: (0, 0)),
            ],
            out_specs=pl.BlockSpec((1, D, TS), lambda bi, si: (bi, 0, si)),
        ),
        compiler_params=pltpu.CompilerParams(
            dimension_semantics=("parallel", "parallel"),   # megacore sharding on v7x
            vmem_limit_bytes=vmem_limit,
        ),
    )(x_flat, w_dk, g, b)

    # (B, D, S) -> (B, D, H2, W2) is a free row-major reshape; no output transpose.
    return out.reshape(B, D, H2, W2)


def _reference(x, conv_weight, ln_gamma, ln_beta, eps=1e-5):
    # Pure-JAX reference mirroring the PyTorch forward.
    B, C, H, W = x.shape
    out_dim = conv_weight.shape[0]
    x0 = x[:, :, 0::2, 0::2]
    x1 = x[:, :, 1::2, 0::2]
    x2 = x[:, :, 0::2, 1::2]
    x3 = x[:, :, 1::2, 1::2]
    xc = jnp.concatenate([x0, x1, x2, x3], axis=1)            # (B, 4C, H2, W2)
    w = conv_weight.reshape(out_dim, 4 * C)
    y = jnp.einsum('bchw,oc->bohw', xc, w)                    # 1x1 conv, no bias
    y = jnp.transpose(y, (0, 2, 3, 1))                        # b h w c
    mean = jnp.mean(y, axis=-1, keepdims=True)
    var = jnp.mean((y - mean) ** 2, axis=-1, keepdims=True)
    y = (y - mean) / jnp.sqrt(var + eps)
    y = y * ln_gamma + ln_beta
    y = jnp.transpose(y, (0, 3, 1, 2))                        # b c h w
    return jnp.maximum(y, 0.0)


if __name__ == "__main__":
    key = jax.random.PRNGKey(0)
    kx, kw = jax.random.split(key)

    B, C, H, W = 2, 4, 16, 16          # in_dim = 4
    out_dim = 32

    x = jax.random.normal(kx, (B, C, H, W), dtype=jnp.float32)
    # Conv2d(4*in_dim, out_dim, kernel_size=1, bias=False) weight: (out_dim, 4C, 1, 1)
    conv_weight = (jax.random.normal(kw, (out_dim, 4 * C, 1, 1), dtype=jnp.float32)
                   * (1.0 / jnp.sqrt(4.0 * C)))
    # LayerNorm(out_dim) default init: gamma=1, beta=0
    ln_gamma = jnp.ones((out_dim,), dtype=jnp.float32)
    ln_beta = jnp.zeros((out_dim,), dtype=jnp.float32)

    out = pixel_merging(x, conv_weight, ln_gamma, ln_beta)
    out = jax.block_until_ready(out)

    ref = _reference(x, conv_weight, ln_gamma, ln_beta)
    assert out.shape == (B, out_dim, H // 2, W // 2), out.shape
    assert jnp.allclose(out, ref, atol=1e-4, rtol=1e-4), float(jnp.max(jnp.abs(out - ref)))

    print("KERNEL_OK")
</pallas_src>

<mosaic_0001>
module attributes {stable_mosaic.version = 11 : i64} {
  func.func @_pixel_merge_kernel(%arg0: i32, %arg1: i32, %arg2: memref<1x64x16xf32, #tpu.memory_space<vmem>>, %arg3: memref<32x16xf32, #tpu.memory_space<vmem>>, %arg4: memref<32x1xf32, #tpu.memory_space<vmem>>, %arg5: memref<32x1xf32, #tpu.memory_space<vmem>>, %arg6: memref<1x32x64xf32, #tpu.memory_space<vmem>>) attributes {dimension_semantics = [#tpu.dimension_semantics<parallel>, #tpu.dimension_semantics<parallel>], iteration_bounds = array<i64: 2, 1>, scalar_prefetch = 0 : i64, scratch_operands = 0 : i64, tpu.core_type = #tpu.core_type<tc>, window_params = [{transform_indices = @transform_0, window_bounds = array<i64: 1, 64, 16>}, {pipeline_mode = #tpu.pipeline_mode<synchronous>, transform_indices = @transform_1, window_bounds = array<i64: 32, 16>}, {pipeline_mode = #tpu.pipeline_mode<synchronous>, transform_indices = @transform_2, window_bounds = array<i64: 32, 1>}, {pipeline_mode = #tpu.pipeline_mode<synchronous>, transform_indices = @transform_3, window_bounds = array<i64: 32, 1>}, {transform_indices = @transform_4, window_bounds = array<i64: 1, 32, 64>}]} {
    %c0 = arith.constant 0 : index
    %c0_0 = arith.constant 0 : index
    %c0_1 = arith.constant 0 : index
    %0 = vector.load %arg2[%c0, %c0_0, %c0_1] : memref<1x64x16xf32, #tpu.memory_space<vmem>>, vector<1x64x16xf32>
    %1 = vector.shape_cast %0 : vector<1x64x16xf32> to vector<64x16xf32>
    %c0_2 = arith.constant 0 : index
    %c0_3 = arith.constant 0 : index
    %2 = vector.load %arg3[%c0_2, %c0_3] : memref<32x16xf32, #tpu.memory_space<vmem>>, vector<32x16xf32>
    %cst = arith.constant dense<0.000000e+00> : vector<32x64xf32>
    %3 = tpu.matmul %2, %1, %cst {dimension_numbers = #tpu.dot_dimension_numbers<[1], [1], [0], [0], [0, 0, 1, 0], [], []>} : vector<32x16xf32>, vector<64x16xf32>, vector<32x64xf32> -> vector<32x64xf32>
    %cst_4 = arith.constant dense<0.000000e+00> : vector<64xf32>
    %4 = vector.multi_reduction <add>, %3, %cst_4 [0] : vector<32x64xf32> to vector<64xf32>
    %5 = vector.shape_cast %4 : vector<64xf32> to vector<1x64xf32>
    %cst_5 = arith.constant 3.125000e-02 : f32
    %6 = vector.broadcast %cst_5 : f32 to vector<1x64xf32>
    %7 = arith.mulf %5, %6 : vector<1x64xf32>
    %8 = vector.broadcast %7 : vector<1x64xf32> to vector<32x64xf32>
    %9 = arith.subf %3, %8 : vector<32x64xf32>
    %10 = arith.mulf %9, %9 : vector<32x64xf32>
    %cst_6 = arith.constant dense<0.000000e+00> : vector<64xf32>
    %11 = vector.multi_reduction <add>, %10, %cst_6 [0] : vector<32x64xf32> to vector<64xf32>
    %12 = vector.shape_cast %11 : vector<64xf32> to vector<1x64xf32>
    %cst_7 = arith.constant 3.125000e-02 : f32
    %13 = vector.broadcast %cst_7 : f32 to vector<1x64xf32>
    %14 = arith.mulf %12, %13 : vector<1x64xf32>
    %cst_8 = arith.constant 9.99999974E-6 : f32
    %15 = vector.broadcast %cst_8 : f32 to vector<1x64xf32>
    %16 = arith.addf %14, %15 : vector<1x64xf32>
    %17 = math.rsqrt %16 : vector<1x64xf32>
    %18 = vector.broadcast %17 : vector<1x64xf32> to vector<32x64xf32>
    %19 = arith.mulf %9, %18 : vector<32x64xf32>
    %c0_9 = arith.constant 0 : index
    %c0_10 = arith.constant 0 : index
    %20 = vector.load %arg4[%c0_9, %c0_10] : memref<32x1xf32, #tpu.memory_space<vmem>>, vector<32x1xf32>
    %21 = vector.broadcast %20 : vector<32x1xf32> to vector<32x64xf32>
    %22 = arith.mulf %19, %21 : vector<32x64xf32>
    %c0_11 = arith.constant 0 : index
    %c0_12 = arith.constant 0 : index
    %23 = vector.load %arg5[%c0_11, %c0_12] : memref<32x1xf32, #tpu.memory_space<vmem>>, vector<32x1xf32>
    %24 = vector.broadcast %23 : vector<32x1xf32> to vector<32x64xf32>
    %25 = arith.addf %22, %24 : vector<32x64xf32>
    %cst_13 = arith.constant 0.000000e+00 : f32
    %26 = vector.broadcast %cst_13 : f32 to vector<32x64xf32>
    %27 = arith.maximumf %25, %26 : vector<32x64xf32>
    %c0_14 = arith.constant 0 : index
    %c0_15 = arith.constant 0 : index
    %c0_16 = arith.constant 0 : index
    %28 = vector.load %arg6[%c0_14, %c0_15, %c0_16] : memref<1x32x64xf32, #tpu.memory_space<vmem>>, vector<1x32x64xf32>
    %29 = vector.shape_cast %28 : vector<1x32x64xf32> to vector<32x64xf32>
    %30 = vector.shape_cast %27 : vector<32x64xf32> to vector<1x32x64xf32>
    tpu.vector_store %arg6[%c0_14, %c0_15, %c0_16], %30 {strides = array<i32>} : memref<1x32x64xf32, #tpu.memory_space<vmem>>, vector<1x32x64xf32>,
    return
  }
  func.func @transform_0(%arg0: i32, %arg1: i32) -> (i32, i32, i32) {
    %c0_i32 = arith.constant 0 : i32
    %c0_i32_0 = arith.constant 0 : i32
    return %arg0, %arg1, %c0_i32 : i32, i32, i32
  }
  func.func @transform_1(%arg0: i32, %arg1: i32) -> (i32, i32) {
    %c0_i32 = arith.constant 0 : i32
    %c0_i32_0 = arith.constant 0 : i32
    %c0_i32_1 = arith.constant 0 : i32
    return %c0_i32, %c0_i32_0 : i32, i32
  }
  func.func @transform_2(%arg0: i32, %arg1: i32) -> (i32, i32) {
    %c0_i32 = arith.constant 0 : i32
    %c0_i32_0 = arith.constant 0 : i32
    %c0_i32_1 = arith.constant 0 : i32
    return %c0_i32, %c0_i32_0 : i32, i32
  }
  func.func @transform_3(%arg0: i32, %arg1: i32) -> (i32, i32) {
    %c0_i32 = arith.constant 0 : i32
    %c0_i32_0 = arith.constant 0 : i32
    %c0_i32_1 = arith.constant 0 : i32
    return %c0_i32, %c0_i32_0 : i32, i32
  }
  func.func @transform_4(%arg0: i32, %arg1: i32) -> (i32, i32, i32) {
    %c0_i32 = arith.constant 0 : i32
    %c0_i32_0 = arith.constant 0 : i32
    return %arg0, %c0_i32, %arg1 : i32, i32, i32
  }
}

</mosaic_0001>

<bundles_post_ra>
// kernel: tpu_custom_call.1
= control target key start
LH: loop header
LB: loop body
LE: loop exit
PB: predicated region body
PF: predicated region fallthrough
CT: control target
= control target key end

     0   :  { %9 = vsyncpa [#allocation3], 0  ;;  %s1043_s0 = inlined_call_operand.vmem [shape: f32[2,64,16], index: 0, kind: input, shape index: {}]   ;;  %s1044_s1 = inlined_call_operand.vmem [shape: f32[32,16], index: 1, kind: input, shape index: {}]   ;;  %s1045_s2 = inlined_call_operand.vmem [shape: f32[32,1], index: 2, kind: input, shape index: {}]   ;;  %s1046_s3 = inlined_call_operand.vmem [shape: f32[32,1], index: 3, kind: input, shape index: {}]   ;;  %s1047_s4 = inlined_call_operand.hbm [shape: f32[2,32,64], index: 4, kind: output, shape index: {}]  }
   0x1   :  { %11 = vsyncpa [#allocation3 + $0x1], 0  ;;  %s824_s15 = smov 0   ;;  %s826_s16 = smov 0  }
   0x2   :  { %s828_s17 = smov 0   ;;  %s830_s18 = smov 0  }
   0x3   :  { %s832_s19 = smov 0   ;;  %s834_s20 = smov 0  }
   0x4 LB: > { %s560_s21 = sadd.s32 4294967295, %s793_s20   ;;  %s561_s22 = sadd.s32 4294967294, %s793_s20   ;;  %s793_s20 = sphi %s834_s20, %s17_s20   ;;  %s789_s19 = sphi %s832_s19, %s1056_s19   ;;  %s785_s18 = sphi %s830_s18, %s1055_s18   ;;  %s781_s17 = sphi %s828_s17, %s1054_s17   ;;  %s777_s16 = sphi %s826_s16, %s1053_s16   ;;  %s773_s15 = sphi %s824_s15, %s1052_s15  }
   0x5   : > { %s29_s23 = sadd.s32 1, %s789_s19  ;;  %s129_s24 = sadd.s32 1, %s781_s17 }
   0x6   : > { %p31_p0 = scmp.ge.s32.totalorder %s29_s23, 2  ;;  %p139_p1 = scmp.ne.s32.totalorder %s781_s17, %s777_s16 }
   0x7   : > { %p140_p2 = scmp.eq.s32.totalorder %s560_s21, 1  ;;  %p145_p3 = scmp.ne.s32.totalorder %s777_s16, %s773_s15 }
   0x8   : > { %s1058_s23 = smov (%p31_p0, %s29_s23), 0  ;;  %p146_p5 = scmp.eq.s32.totalorder %s561_s22, 1 }
   0x9   : > { %p864_p4 = por %p140_p2, %p139_p1  ;;  %s124_s26 = ssub.s32 %s789_s19, %s1058_s23 }
   0xa   : > { %p564_p6 = scmp.ge.s32.totalorder %s793_s20, 1  ;;  %p127_p7 = scmp.eq.s32.totalorder %s124_s26, 0 }
   0xb   : > { %p871_p8 = por %p146_p5, %p145_p3  ;;  %p186_p9 = scmp.lt.s32.totalorder %s793_s20, 3 }
   0xc   : > { %s877_s28 = scalar_select %p127_p7, %s781_s17, %s129_s24  }
   0xd   : > { %p187_p10 = pnand %p564_p6, %p186_p9 }
   0xe   : > { %p217_p11 = scmp.lt.s32.totalorder (!%p187_p10), %s785_s18, 1  ;;  %vm238_vm0 = vcmask (!%p187_p10), 130048   ;;  %v234_v0 = vld [vmem:[%s1044_s1] sm:$0xff] (!%p187_p10)  ;;  %v236_v1 = vld [vmem:[%s1044_s1 + $0x10] sm:$0xff] (!%p187_p10)  ;;  %v795_v3 = vmov (!%p187_p10), 0   ;;  %v406_v5 = vld [vmem:[%s1045_s2 + $0x18] sm:$0xff] (!%p187_p10) }
   0xf   : > { %190 = sbr.rel (%p187_p10) target bundleno = 357 (0x165), region = 36  ;;  %615 = vmatprep.mubr.msk.f32.mxu0 (!%p187_p10), %vm238_vm0, %v234_v0  ;;  %618 = vmatprep.mubr.msk.f32.mxu1 (!%p187_p10), %vm238_vm0, %v236_v1  ;;  %v405_v2 = vld [vmem:[%s1045_s2 + $0x10] sm:$0xff] (!%p187_p10)  ;;  %v403_v4 = vld [vmem:[%s1045_s2] sm:$0xff] (!%p187_p10)  ;;  %v404_v6 = vld [vmem:[%s1045_s2 + $0x8] sm:$0xff] (!%p187_p10)  ;;  %vm360_vm2 = vcmask (!%p187_p10), 523264   ;;  %s213_s22 = sand.u32 (!%p187_p10), 1, %s777_s16  }
  0x10   : > { %712 = vset.pattern.permute.xlu1 (!%p187_p10), %v795_v3  ;;  %711 = vset.pattern.permute.xlu0 (!%p187_p10), %v795_v3  ;;  %vm908_vm1 = vmpackc.low (!%p187_p10), %vm238_vm0, %vm238_vm0  ;;  %v432_v14 = vld [vmem:[%s1046_s3 + $0x8] sm:$0xff] (!%p187_p10)  ;;  %v431_v15 = vld [vmem:[%s1046_s3] sm:$0xff] (!%p187_p10)  ;;  %s565_s24 = sshll.u32 (!%p187_p10), %s213_s22, 5  ;;  %s586_s30 = sshll.u32 (!%p187_p10), %s785_s18, 9 }
  0x11   : > { %419 = vperm.xlu1 (!%p187_p10), %712, %v405_v2   ;;  %409 = vperm.xlu0 (!%p187_p10), %711, %v403_v4   ;;  %v434_v18 = vld [vmem:[%s1046_s3 + $0x18] sm:$0xff] (!%p187_p10)  ;;  %v433_v19 = vld [vmem:[%s1046_s3 + $0x10] sm:$0xff] (!%p187_p10)  ;;  %v235_v24 = vld [vmem:[%s1044_s1 + $0x8] sm:$0xff] (!%p187_p10)  ;;  %s215_s26 = scalar_lea.vmem (!%p187_p10), [#allocation2], %s565_s24  ;;  %s989_s7 = scalar_lea.hbm (!%p187_p10), %s1047_s4, %s586_s30 }
  0x12   : > { %v237_v25 = vld [vmem:[%s1044_s1 + $0x18] sm:$0xff] (!%p187_p10) }
  0x15   : > { %424 = vperm.xlu1 (!%p187_p10), %712, %v406_v5   ;;  %414 = vperm.xlu0 (!%p187_p10), %711, %v404_v6  }
  0x16   : > { %s218_s9 = scalar_select %p217_p11, %s785_s18, 1 }
  0x17   : > { %s997_s18 = scalar_lea.sflag [#allocation3], %s213_s22 }
  0x18   : > { %s585_s12 = sshll.u32 %s218_s9, 6  ;;  %s796_s9 = smov [#allocation2]  }
  0x19   : > { %s904_s29 = scalar_lea.vmem %s1043_s0, %s585_s12  ;;  %442 = vperm.xlu1 %712, %v432_v14   ;;  %437 = vperm.xlu0 %711, %v431_v15   ;;  %s719_s10 = sshll.u32 %s796_s9, 4  ;;  %s720_s10 = int_to_ptr.vmem [resolvable:$false] %s719_s10 }
  0x1a   : > { %v226_v8 = vld [vmem:[%s904_s29] sm:$0xff]  ;;  %v227_v9 = vld [vmem:[%s904_s29 + $0x8] sm:$0xff]  ;;  %v228_v10 = vld [vmem:[%s904_s29 + $0x10] sm:$0xff]  ;;  %s721_s11 = scalar_lea.vmem %s720_s10, 1024 }
  0x1b   : > { %v621_v11 = vpack.c.bf16 %v227_v9, %v226_v8  ;;  %v229_v12 = vld [vmem:[%s904_s29 + $0x18] sm:$0xff]  ;;  %v230_v16 = vld [vmem:[%s904_s29 + $0x20] sm:$0xff]  ;;  %v231_v17 = vld [vmem:[%s904_s29 + $0x28] sm:$0xff] }
  0x1c   : > { %v627_v13 = vpack.c.bf16 %v229_v12, %v228_v10  ;;  %v633_v20 = vpack.c.bf16 %v231_v17, %v230_v16  ;;  %v232_v21 = vld [vmem:[%s904_s29 + $0x30] sm:$0xff]  ;;  %v233_v22 = vld [vmem:[%s904_s29 + $0x38] sm:$0xff]  ;;  %s482_s29 = sshll.u32 %s215_s26, 4  ;;  %s984_s29 = int_to_ptr.vmem [resolvable:$true] %s482_s29 }
  0x1d   : > { %623 = vmatprep.subr.msk.bf16.mxu0 %vm908_vm1, %v621_v11  ;;  %645 = vmatprep.subr.msk.bf16.mxu1 %vm908_vm1, %v621_v11  ;;  %v639_v23 = vpack.c.bf16 %v233_v22, %v232_v21  ;;  %s715_s8 = scalar_lea.vmem %s984_s29, 512  ;;  %p722_p1 = scmp.lt.s32.totalorder %s984_s29, %s720_s10 }
  0x1e   : > { %626 = vmatpush3.bf16.xpose.msk.msra.mxu0 %vm908_vm1, %v621_v11  ;;  %649 = vmatpush3.bf16.xpose.msk.msra.mxu1 %vm908_vm1, %v621_v11  ;;  %p716_p12 = scmp.ne.s32.totalorder %s984_s29, %s715_s8  ;;  %p723_p2 = scmp.lt.s32.totalorder %s721_s11, %s715_s8 }
  0x1f   : > { %629 = vmatprep.subr.msk.bf16.mxu0 %vm908_vm1, %v627_v13  ;;  %646 = vmatprep.subr.msk.bf16.mxu1 %vm908_vm1, %v627_v13 }
  0x20   : > { %452 = vperm.xlu1 %712, %v434_v18   ;;  %447 = vperm.xlu0 %711, %v433_v19   ;;  %p717_p13 = pnand %p716_p12, %p864_p4  ;;  %p724_p3 = por %p723_p2, %p722_p1 }
  0x22   : > { %p718_p0 = pneg %p717_p13 }
  0x24   : > { %p725_p5 = pnand %p724_p3, %p718_p0 }
  0x26   : > { %632 = vmatpush3.bf16.xpose.msk.msra.mxu0 %vm908_vm1, %v627_v13  ;;  %650 = vmatpush3.bf16.xpose.msk.msra.mxu1 %vm908_vm1, %v627_v13 }
  0x27   : > { %635 = vmatprep.subr.msk.bf16.mxu0 %vm908_vm1, %v633_v20  ;;  %647 = vmatprep.subr.msk.bf16.mxu1 %vm908_vm1, %v633_v20 }
  0x2e   : > { %638 = vmatpush3.bf16.xpose.msk.msra.mxu0 %vm908_vm1, %v633_v20  ;;  %651 = vmatpush3.bf16.xpose.msk.msra.mxu1 %vm908_vm1, %v633_v20 }
  0x2f   : > { %641 = vmatprep.subr.msk.bf16.mxu0 %vm908_vm1, %v639_v23  ;;  %648 = vmatprep.subr.msk.bf16.mxu1 %vm908_vm1, %v639_v23 }
  0x36   : > { %644 = vmatpush3.bf16.xpose.msk.msra.mxu0 %vm908_vm1, %v639_v23  ;;  %652 = vmatpush3.bf16.xpose.msk.msra.mxu1 %vm908_vm1, %v639_v23 }
  0x3d   : > { %616 = vmatmul.mubr.msk.f32.vlgmr.msra.gmra.mrb[0].mxu0 %vm238_vm0, %v235_v24  ;;  %619 = vmatmul.mubr.msk.f32.vlgmr.msra.gmra.mrb[0].mxu1 %vm238_vm0, %v237_v25 }
  0x90   : > { %v420_v2 = vpop.permute.xlu1 %419  ;;  %v410_v3 = vpop.permute.xlu0 %409 }
  0x94   : > { %v425_v5 = vpop.permute.xlu1 %424  ;;  %v415_v6 = vpop.permute.xlu0 %414 }
  0x98   : > { %v443_v7 = vpop.permute.xlu1 %442  ;;  %v438_v8 = vpop.permute.xlu0 %437 }
  0x9f   : > { %v453_v18 = vpop.permute.xlu1 %452  ;;  %v448_v19 = vpop.permute.xlu0 %447 }
 0x110   : > { %v617_v26 = vpop.f32.mrb[0].mxu0  ;;  %v620_v27 = vpop.f32.mrb[0].mxu1 }
 0x111   : > { %v362_v28 = vsel %vm360_vm2, %v617_v26, 0.0  ;;  %v341_v29 = vpop.f32.mrb[1].mxu0  ;;  %v351_v30 = vpop.f32.mrb[1].mxu1  ;;  %v366_v35 = vsel %vm360_vm2, %v620_v27, 0.0 }
 0x112   : > { %v361_v31 = vsel %vm360_vm2, %v341_v29, 0.0  ;;  %v364_v32 = vsel %vm360_vm2, %v351_v30, 0.0 }
 0x113   : > { %v363_v33 = vadd.f32 %v362_v28, %v361_v31 }
 0x115   : > { %v365_v34 = vadd.f32 %v364_v32, %v363_v33 }
 0x117   : > { %v367_v36 = vadd.f32 %v366_v35, %v365_v34 }
 0x119   : > { %v368_v37 = vrot.slane %v367_v36, 4 }
 0x11b   : > { %v369_v38 = vadd.f32 %v368_v37, %v367_v36 }
 0x11d   : > { %v370_v39 = vrot.slane %v369_v38, 2 }
 0x11f   : > { %v371_v40 = vadd.f32 %v370_v39, %v369_v38 }
 0x121   : > { %v372_v41 = vrot.slane %v371_v40, 1 }
 0x123   : > { %v373_v42 = vadd.f32 %v372_v41, %v371_v40 }
 0x125   : > { %v374_v43 = vmul.f32 0.03125, %v373_v42 }
 0x127   : > { %v375_v44 = vsub.f32 %v341_v29, %v374_v43  ;;  %v376_v45 = vsub.f32 %v617_v26, %v374_v43  ;;  %v377_v46 = vsub.f32 %v351_v30, %v374_v43  ;;  %v378_v47 = vsub.f32 %v620_v27, %v374_v43 }
 0x129   : > { %v379_v48 = vmul.f32 %v375_v44, %v375_v44  ;;  %v380_v49 = vmul.f32 %v376_v45, %v376_v45  ;;  %v381_v50 = vmul.f32 %v377_v46, %v377_v46  ;;  %v382_v51 = vmul.f32 %v378_v47, %v378_v47 }
 0x12b   : > { %v383_v52 = vsel %vm360_vm2, %v379_v48, 0.0  ;;  %v384_v53 = vsel %vm360_vm2, %v380_v49, 0.0  ;;  %v386_v55 = vsel %vm360_vm2, %v381_v50, 0.0  ;;  %v388_v57 = vsel %vm360_vm2, %v382_v51, 0.0 }
 0x12c   : > { %v385_v54 = vadd.f32 %v384_v53, %v383_v52 }
 0x12e   : > { %v387_v56 = vadd.f32 %v386_v55, %v385_v54 }
 0x130   : > { %v389_v58 = vadd.f32 %v388_v57, %v387_v56 }
 0x132   : > { %v390_v59 = vrot.slane %v389_v58, 4 }
 0x134   : > { %v391_v60 = vadd.f32 %v390_v59, %v389_v58 }
 0x136   : > { %v392_v61 = vrot.slane %v391_v60, 2 }
 0x138   : > { %v393_v62 = vadd.f32 %v392_v61, %v391_v60 }
 0x13a   : > { %v394_v63 = vrot.slane %v393_v62, 1 }
 0x13c   : > { %v395_v0 = vadd.f32 %v394_v63, %v393_v62 }
 0x13e   : > { %v396_v1 = vmul.f32 0.03125, %v395_v0 }
 0x140   : > { %v397_v4 = vadd.f32 1e-05, %v396_v1 }
 0x142   : > { %713 = vrsqrt.f32 %v397_v4 }
 0x14c   : > { %v714_v9 = vpop.eup %713 }
 0x14d   : > { %v401_v10 = vmul.f32 %v714_v9, %v377_v46  ;;  %v399_v11 = vmul.f32 %v714_v9, %v375_v44  ;;  %v402_v12 = vmul.f32 %v714_v9, %v378_v47  ;;  %v400_v13 = vmul.f32 %v714_v9, %v376_v45 }
 0x14f   : > { %v429_v14 = vmul.f32 %v420_v2, %v401_v10  ;;  %v427_v15 = vmul.f32 %v410_v3, %v399_v11  ;;  %v430_v16 = vmul.f32 %v425_v5, %v402_v12  ;;  %v428_v17 = vmul.f32 %v415_v6, %v400_v13 }
 0x151   : > { %v456_v20 = vadd.f32 %v443_v7, %v428_v17  ;;  %v455_v21 = vadd.f32 %v438_v8, %v427_v15  ;;  %v458_v22 = vadd.f32 %v453_v18, %v430_v16  ;;  %v457_v23 = vadd.f32 %v448_v19, %v429_v14 }
 0x153   : > { %v460_v24 = vmax.f32 %v456_v20, 0.0  ;;  %v459_v25 = vmax.f32 %v455_v21, 0.0  ;;  %v462_v26 = vmax.f32 %v458_v22, 0.0  ;;  %v461_v27 = vmax.f32 %v457_v23, 0.0 }
 0x155   : > { %464 = vst.msk [vmem:[%s215_s26 + $0x8] sm:$0xff] %vm360_vm2, %v460_v24  ;;  %463 = vst.msk [vmem:[%s215_s26] sm:$0xff] %vm360_vm2, %v459_v25 }
 0x156   : > { %466 = vst.msk [vmem:[%s215_s26 + $0x18] sm:$0xff] %vm360_vm2, %v462_v26  ;;  %465 = vst.msk [vmem:[%s215_s26 + $0x10] sm:$0xff] %vm360_vm2, %v461_v27 }
 0x157   : > { %728 = shalt.err (!%p725_p5)
}
 0x158   : > { %s729_s12 = scalar_lea.hbm %s989_s7, 512  ;;  %s733_s21 = scalar_lea.hbm %s1047_s4, 1024 }
 0x159   : > { %p730_p6 = scmp.ne.s32.totalorder %s989_s7, %s729_s12  ;;  %p734_p10 = scmp.lt.u32.totalorder %s989_s7, %s1047_s4 }
 0x15a   : > { %p735_p11 = scmp.lt.u32.totalorder %s733_s21, %s729_s12  ;;  %p737_p13 = scmp.lt.u32.totalorder %s729_s12, %s989_s7 }
 0x15b   : > { %p731_p7 = pnand %p730_p6, %p864_p4 }
 0x15c   : > { %p736_p12 = por %p735_p11, %p734_p10 }
 0x15d   : > { %p732_p9 = pneg %p731_p7 }
 0x15e   : > { %p738_p0 = por %p737_p13, %p736_p12 }
 0x160   : > { %p739_p1 = pnand %p738_p0, %p732_p9 }
 0x162   : > { %742 = shalt.err (!%p739_p1)
}
 0x163   : > { %s797_s26 = smov 128   ;;  %s798_s30 = smov 8  }
 0x164   : > { %653 = dma.vmem_to_hbm [thread:$0]  (%p864_p4), %s984_s29, 512, %s989_s7, %s997_s18, %s797_s26, %s797_s26, %s798_s30  }
 0x165 PF: > { %p659_p2 = scmp.ge.s32.totalorder %s793_s20, 2  ;;  %s497_s5 = sand.u32 1, %s773_s15  }
 0x166   : > { %s498_s6 = scalar_lea.sflag [#allocation3], %s497_s5 }
 0x167   : > { %p656_p3 = pnand %p659_p2, %p871_p8 }
 0x169   : > { %768 = dma.done.wait (!%p656_p3), %s498_s6, 512  }
 0x16a   : > { %770 = vsyncadd (!%p656_p3), %s498_s6, 4294966784  ;;  %s17_s20 = sadd.s32 1, %s793_s20   ;;  %s1052_s15 = smov %s777_s16 }
 0x16b   : > { %p14_p5 = scmp.ge.s32.totalorder %s17_s20, 4   ;;  %s1053_s16 = smov %s781_s17 }
 0x16c   : > { %s1054_s17 = smov %s877_s28  ;;  %s1055_s18 = smov %s789_s19 }
 0x16d   : > { %s1056_s19 = smov %s1058_s23  ;;  %16 = sbr.rel (!%p14_p5) target bundleno = 4 (0x4), region = 71 }
 0x174   :  { %503 = vsyncpa [#allocation3], 1 }
 0x175   :  { %505 = vsyncpa [#allocation3 + $0x1], 1 }

</bundles_post_ra>
